<compile_context>
chip_gen: v6e
topology: v6e:2x2x1
jax: 0.10.0
libtpu: 0.0.40
codegen_flags: <defaults>
</compile_context>

<pallas_src>
import math
import functools

import jax
import jax.numpy as jnp
from jax.experimental import pallas as pl
from jax.experimental.pallas import tpu as pltpu


def _build_pos_encoding(max_seq_len: int, d_model: int) -> jnp.ndarray:
    """Deterministic sinusoidal positional-encoding table (max_seq_len, d_model)."""
    assert d_model % 2 == 0, "d_model must be even (matches PyTorch slicing)"
    position = jnp.arange(max_seq_len, dtype=jnp.float32)[:, None]            # (S, 1)
    log_scale = jnp.exp(
        jnp.arange(0, d_model, 2, dtype=jnp.float32) * (-math.log(10000.0) / d_model)
    )                                                                          # (D/2,)
    args = position * log_scale                                                # (S, D/2)
    # interleave: even columns = sin, odd columns = cos
    pe = jnp.stack([jnp.sin(args), jnp.cos(args)], axis=-1).reshape(max_seq_len, d_model)
    return pe.astype(jnp.float32)


def _pos_encoder_kernel(x_ref, pe_ref, o_ref, *, scale):
    # x_ref: (Bb, rows, lane); pe_ref: (rows, lane) broadcast over the batch dim.
    # Compute in f32 (bf16-safe), store in out dtype.
    x = x_ref[...].astype(jnp.float32)
    pe = pe_ref[...].astype(jnp.float32)
    o_ref[...] = (x * scale + pe[None, :, :]).astype(o_ref.dtype)


# Target total tile bytes per grid step (x + out + pe). Double-buffered this is
# ~16 MiB live VMEM: safe on v7x (64 MiB physical / 32 MiB scoped default) and
# comfortably near the measured elementwise roofline on v5e/v6e.
_TILE_TOTAL_BYTES = 8 * 1024 * 1024


def positional_encoder(x: jnp.ndarray,
                       pos_encoding: jnp.ndarray,
                       d_model: int,
                       *,
                       donate_x: bool = False) -> jnp.ndarray:
    """x: (B, S, D); pos_encoding: (max_seq_len, D)."""
    B, S, D = x.shape
    assert D == d_model
    max_seq_len = pos_encoding.shape[0]
    assert S <= max_seq_len, "sequence longer than positional-encoding table"

    x_bytes = x.dtype.itemsize
    if x_bytes < 4:
        pe_dtype, pe_bytes = x.dtype, x_bytes      # bf16/f16: halve pe HBM traffic
    else:
        pe_dtype, pe_bytes = jnp.float32, 4

    # ---- lane-dense view / padding --------------------------------------------
    pad = 0
    pe2 = None                      # decided later for the D % 128 == 0 path
    if D % 128 == 0:
        L, lane = S, D
        x2 = x
    elif (S * D) % 128 == 0:
        # Flatten (S, D) row-major onto full 128-wide lanes; element
        # correspondence between x and pe is preserved, stores become full-lane.
        L, lane = (S * D) // 128, 128
        x2 = x.reshape(B, L, lane)
        pe2 = pos_encoding[:S].astype(pe_dtype).reshape(L, lane)
    else:
        # Fallback: pad D up to a lane multiple so stores are never masked.
        Dp = ((D + 127) // 128) * 128
        pad = Dp - D
        L, lane = S, Dp
        x2 = jnp.pad(x, ((0, 0), (0, 0), (0, pad)))
        pe2 = jnp.pad(pos_encoding[:S].astype(pe_dtype), ((0, 0), (0, pad)))

    # ---- dtype-aware row-tile sizing -------------------------------------------
    xo_row = lane * (2 * x_bytes)               # x tile + out tile, per row
    pe_row = lane * pe_bytes
    rows = _TILE_TOTAL_BYTES // (xo_row + pe_row)
    rows = max(8, (rows // 8) * 8)              # (8, 128) tiling constraint
    if rows >= L:
        rows = L                                # full extent is always legal
    n_tiles = pl.cdiv(L, rows)

    if pe2 is None:
        # D % 128 == 0 path: pass the table unsliced (no wrapper slice/astype
        # round-trip) whenever the block shape stays legal against it.
        use_full_table = (pos_encoding.dtype == pe_dtype
                          and (rows % 8 == 0 or S == max_seq_len))
        pe2 = pos_encoding if use_full_table else pos_encoding[:S].astype(pe_dtype)

    # ---- fold batch elements per grid step when one tile covers all rows --------
    Bb = 1
    if n_tiles == 1:
        per_batch = L * xo_row
        budget_left = _TILE_TOTAL_BYTES - L * pe_row
        if per_batch > 0 and budget_left > per_batch:
            Bb = int(min(B, budget_left // per_batch))
        Bb = max(Bb, 1)
    nb = pl.cdiv(B, Bb)

    kernel = functools.partial(_pos_encoder_kernel, scale=math.sqrt(d_model))

    out = pl.pallas_call(
        kernel,
        out_shape=jax.ShapeDtypeStruct((B, L, lane), x.dtype),
        grid_spec=pltpu.PrefetchScalarGridSpec(
            num_scalar_prefetch=0,
            # Batch innermost: pe's block index is constant across consecutive
            # steps, so its tile is not re-DMA'd once per batch element.
            grid=(n_tiles, nb),
            in_specs=[
                pl.BlockSpec((Bb, rows, lane), lambda s, b: (b, s, 0)),
                pl.BlockSpec((rows, lane), lambda s, b: (s, 0)),
            ],
            out_specs=pl.BlockSpec((Bb, rows, lane), lambda s, b: (b, s, 0)),
        ),
        compiler_params=pltpu.CompilerParams(
            # Leading (row-tile) axis sharded across v7x's two TensorCores even
            # when B == 1; neutral on single-TC v5e/v6e.
            dimension_semantics=("parallel", "parallel"),
            # Live footprint ~16 MiB double-buffered; 32 MiB budget fits every
            # generation (v7x physical 64 MiB, v5e/v6e 128 MiB).
            vmem_limit_bytes=32 * 1024 * 1024,
        ),
        # Optional in-place update when the caller donates x (footprint only;
        # HBM traffic unchanged; only truly in-place if x2 is a bitcast of x).
        input_output_aliases=({0: 0} if donate_x else {}),
    )(x2, pe2)

    if pad:
        out = out[:, :, :D]
    elif lane != D:
        out = out.reshape(B, S, D)
    return out


if __name__ == "__main__":
    key = jax.random.PRNGKey(0)

    # --- main case: d_model=32, max_seq_len=16, batch=2, seq=8 (flattened-lane path)
    d_model, max_seq_len, batch, seq = 32, 16, 2, 8
    pe_table = _build_pos_encoding(max_seq_len, d_model)
    x = jax.random.normal(key, (batch, seq, d_model), dtype=jnp.float32)
    out = jax.block_until_ready(positional_encoder(x, pe_table, d_model))
    ref = x * math.sqrt(d_model) + pe_table[:seq, :]
    assert out.shape == (batch, seq, d_model)
    assert jnp.allclose(out, ref, atol=1e-5, rtol=1e-5)

    # --- D % 128 == 0 path (unsliced pe table, batch folded into one grid step)
    d2 = 128
    pe2_table = _build_pos_encoding(max_seq_len, d2)
    x2 = jax.random.normal(jax.random.PRNGKey(1), (batch, seq, d2), dtype=jnp.float32)
    out2 = jax.block_until_ready(positional_encoder(x2, pe2_table, d2))
    ref2 = x2 * math.sqrt(d2) + pe2_table[:seq, :]
    assert jnp.allclose(out2, ref2, atol=1e-5, rtol=1e-5)

    # --- padding fallback path (D and S*D not lane multiples)
    d3, seq3, b3 = 20, 7, 3
    pe3_table = _build_pos_encoding(max_seq_len, d3)
    x3 = jax.random.normal(jax.random.PRNGKey(2), (b3, seq3, d3), dtype=jnp.float32)
    out3 = jax.block_until_ready(positional_encoder(x3, pe3_table, d3))
    ref3 = x3 * math.sqrt(d3) + pe3_table[:seq3, :]
    assert out3.shape == (b3, seq3, d3)
    assert jnp.allclose(out3, ref3, atol=1e-5, rtol=1e-5)

    # --- bf16 input (pe carried in bf16, compute in f32)
    xb = x.astype(jnp.bfloat16)
    outb = jax.block_until_ready(positional_encoder(xb, pe_table, d_model))
    refb = (xb.astype(jnp.float32) * math.sqrt(d_model)
            + pe_table[:seq, :].astype(jnp.bfloat16).astype(jnp.float32)
            ).astype(jnp.bfloat16)
    assert jnp.allclose(outb.astype(jnp.float32), refb.astype(jnp.float32),
                        atol=1e-2, rtol=1e-2)

    print("KERNEL_OK")
</pallas_src>

<mosaic_0001>
module attributes {stable_mosaic.version = 11 : i64} {
  func.func @_pos_encoder_kernel(%arg0: i32, %arg1: i32, %arg2: memref<2x2x128xf32, #tpu.memory_space<vmem>>, %arg3: memref<2x128xf32, #tpu.memory_space<vmem>>, %arg4: memref<2x2x128xf32, #tpu.memory_space<vmem>>) attributes {dimension_semantics = [#tpu.dimension_semantics<parallel>, #tpu.dimension_semantics<parallel>], iteration_bounds = array<i64: 1, 1>, scalar_prefetch = 0 : i64, scratch_operands = 0 : i64, tpu.core_type = #tpu.core_type<tc>, window_params = [{transform_indices = @transform_0, window_bounds = array<i64: 2, 2, 128>}, {transform_indices = @transform_1, window_bounds = array<i64: 2, 128>}, {transform_indices = @transform_2, window_bounds = array<i64: 2, 2, 128>}]} {
    %c0 = arith.constant 0 : index
    %c0_0 = arith.constant 0 : index
    %c0_1 = arith.constant 0 : index
    %0 = vector.load %arg2[%c0, %c0_0, %c0_1] : memref<2x2x128xf32, #tpu.memory_space<vmem>>, vector<2x2x128xf32>
    %c0_2 = arith.constant 0 : index
    %c0_3 = arith.constant 0 : index
    %1 = vector.load %arg3[%c0_2, %c0_3] : memref<2x128xf32, #tpu.memory_space<vmem>>, vector<2x128xf32>
    %cst = arith.constant 5.65685415 : f32
    %2 = vector.broadcast %cst : f32 to vector<2x2x128xf32>
    %3 = arith.mulf %0, %2 : vector<2x2x128xf32>
    %4 = vector.shape_cast %1 : vector<2x128xf32> to vector<1x2x128xf32>
    %5 = vector.broadcast %4 : vector<1x2x128xf32> to vector<2x2x128xf32>
    %6 = arith.addf %3, %5 : vector<2x2x128xf32>
    %c0_4 = arith.constant 0 : index
    %c0_5 = arith.constant 0 : index
    %c0_6 = arith.constant 0 : index
    %7 = vector.load %arg4[%c0_4, %c0_5, %c0_6] : memref<2x2x128xf32, #tpu.memory_space<vmem>>, vector<2x2x128xf32>
    tpu.vector_store %arg4[%c0_4, %c0_5, %c0_6], %6 {strides = array<i32>} : memref<2x2x128xf32, #tpu.memory_space<vmem>>, vector<2x2x128xf32>,
    return
  }
  func.func @transform_0(%arg0: i32, %arg1: i32) -> (i32, i32, i32) {
    %c0_i32 = arith.constant 0 : i32
    %c0_i32_0 = arith.constant 0 : i32
    return %arg1, %arg0, %c0_i32 : i32, i32, i32
  }
  func.func @transform_1(%arg0: i32, %arg1: i32) -> (i32, i32) {
    %c0_i32 = arith.constant 0 : i32
    %c0_i32_0 = arith.constant 0 : i32
    return %arg0, %c0_i32 : i32, i32
  }
  func.func @transform_2(%arg0: i32, %arg1: i32) -> (i32, i32, i32) {
    %c0_i32 = arith.constant 0 : i32
    %c0_i32_0 = arith.constant 0 : i32
    return %arg1, %arg0, %c0_i32 : i32, i32, i32
  }
}

</mosaic_0001>

<bundles_post_ra>
// kernel: tpu_custom_call.1
= control target key start
LH: loop header
LB: loop body
LE: loop exit
PB: predicated region body
PF: predicated region fallthrough
CT: control target
= control target key end

     0   :  { %7 = vsyncpa [#allocation3], 0  ;;  %s171_s0 = inlined_call_operand.hbm [shape: f32[2,2,128], index: 0, kind: input, shape index: {}]   ;;  %s172_s1 = inlined_call_operand.hbm [shape: f32[2,128], index: 1, kind: input, shape index: {}]   ;;  %s173_s2 = inlined_call_operand.hbm [shape: f32[2,2,128], index: 2, kind: output, shape index: {}]  }
   0x1   :  { %8 = vsyncpa [#allocation6], 0 }
   0x2   :  { %9 = vsyncpa [#allocation4], 0  ;;  %s136_s9 = smov [#allocation2]  }
   0x3   :  { %s15_s10 = sshll.u32 %s136_s9, 4  ;;  %s16_s10 = int_to_ptr.vmem [resolvable:$true] %s15_s10 }
   0x4   :  { %s78_s11 = scalar_lea.vmem %s16_s10, 64  ;;  %p83_p1 = scmp.lt.s32.totalorder %s16_s10, %s16_s10 }
   0x5   :  { %p79_p0 = scmp.ne.s32.totalorder %s16_s10, %s78_s11  ;;  %p84_p2 = scmp.lt.s32.totalorder %s78_s11, %s78_s11 }
   0x7   :  { %p85_p3 = por %p84_p2, %p83_p1 }
   0x9   :  { %p86_p4 = pnand %p85_p3, %p79_p0 }
   0xb   :  { %89 = shalt.err (!%p86_p4)
}
   0xc   :  { %s137_s12 = smov 32   ;;  %s138_s13 = smov 2  }
   0xd   :  { %21 = dma.hbm_to_vmem [thread:$0]  %s171_s0, 64, %s16_s10, [#allocation3], %s137_s12, %s137_s12, %s138_s13  }
   0xe   :  { %s139_s16 = smov [#allocation5]  }
   0xf   :  { %s28_s17 = sshll.u32 %s139_s16, 4  ;;  %s29_s17 = int_to_ptr.vmem [resolvable:$true] %s28_s17 }
  0x10   :  { %s98_s18 = scalar_lea.vmem %s29_s17, 32  ;;  %p103_p6 = scmp.lt.s32.totalorder %s29_s17, %s29_s17 }
  0x11   :  { %p99_p5 = scmp.ne.s32.totalorder %s29_s17, %s98_s18  ;;  %p104_p7 = scmp.lt.s32.totalorder %s98_s18, %s98_s18 }
  0x13   :  { %p105_p8 = por %p104_p7, %p103_p6 }
  0x15   :  { %p106_p9 = pnand %p105_p8, %p99_p5 }
  0x17   :  { %109 = shalt.err (!%p106_p9)
}
  0x18   :  { %31 = dma.hbm_to_vmem [thread:$0]  %s172_s1, 32, %s29_s17, [#allocation6]  }
  0x19   :  { %130 = dma.done.wait [#allocation3], 64  }
  0x1a   :  { %131 = vsyncadd [#allocation3], 4294967232 }
  0x1b   :  { %132 = dma.done.wait [#allocation6], 32  }
  0x1c   :  { %133 = vsyncadd [#allocation6], 4294967264  ;;  %s140_s21 = smov [#allocation7]   ;;  %v38_v0 = vld [vmem:[#allocation2] sm:$0x3] }
  0x1d   :  { %s52_s0 = sshll.u32 %s140_s21, 4  ;;  %v40_v1 = vld [vmem:[#allocation5] sm:$0x3]  ;;  %v39_v2 = vld [vmem:[#allocation2 + $0x2] sm:$0x3]  ;;  %s53_s0 = int_to_ptr.vmem [resolvable:$true] %s52_s0 }
  0x1e   :  { %v41_v3 = vmul.f32 5.656854, %v38_v0  ;;  %v42_v4 = vmul.f32 5.656854, %v39_v2  ;;  %s110_s22 = scalar_lea.vmem %s53_s0, 64  ;;  %p115_p11 = scmp.lt.s32.totalorder %s53_s0, %s53_s0 }
  0x1f   :  { %p111_p10 = scmp.ne.s32.totalorder %s53_s0, %s110_s22  ;;  %p116_p12 = scmp.lt.s32.totalorder %s110_s22, %s110_s22 }
  0x20   :  { %v43_v5 = vadd.f32 %v41_v3, %v40_v1  ;;  %v44_v6 = vadd.f32 %v42_v4, %v40_v1 }
  0x21   :  { %p117_p13 = por %p116_p12, %p115_p11 }
  0x22   :  { %45 = vst [vmem:[#allocation7] sm:$0x3] %v43_v5  ;;  %46 = vst [vmem:[#allocation7 + $0x2] sm:$0x3] %v44_v6 }
  0x23   :  { %p118_p0 = pnand %p117_p13, %p111_p10 }
  0x25   :  { %121 = shalt.err (!%p118_p0)
}
  0x26   :  { %58 = dma.vmem_to_hbm [thread:$0]  %s53_s0, 64, %s173_s2, [#allocation4], %s137_s12, %s137_s12, %s138_s13  }
  0x27   :  { %134 = dma.done.wait [#allocation4], 64  }
  0x28   :  { %135 = vsyncadd [#allocation4], 4294967232 }
  0x29   :  { %62 = vsyncpa [#allocation3], 1 }
  0x2a   :  { %63 = vsyncpa [#allocation6], 1 }
  0x2b   :  { %64 = vsyncpa [#allocation4], 1 }

</bundles_post_ra>
